<compile_context>
chip_gen: v7x
topology: tpu7x:2x2x1
jax: 0.10.0
libtpu: 0.0.40
codegen_flags: <defaults>
</compile_context>

<pallas_src>
import jax
import jax.numpy as jnp
from jax.experimental import pallas as pl
from jax.experimental.pallas import tpu as pltpu


def _mlp_kernel(x_ref, w1_ref, b1_ref, w2_ref, b2_ref, w3_ref, b3_ref, o_ref):
    # x_ref: (n_in, tile_m)  -- batch on lanes
    x = x_ref[...]

    # Layer 1: W1 @ X + b1, LeakyReLU(0.01)  -> (h1, tile_m)
    h1 = jnp.dot(w1_ref[...], x, preferred_element_type=jnp.float32) + b1_ref[...]
    h1 = jnp.where(h1 > 0, h1, 0.01 * h1)

    # Layer 2: W2 @ H1 + b2, LeakyReLU(0.01) -> (h2, tile_m)
    h2 = jnp.dot(w2_ref[...], h1, preferred_element_type=jnp.float32) + b2_ref[...]
    h2 = jnp.where(h2 > 0, h2, 0.01 * h2)

    # Layer 3: W3 @ H2 + b3, ReLU            -> (n_out, tile_m)
    h3 = jnp.dot(w3_ref[...], h2, preferred_element_type=jnp.float32) + b3_ref[...]
    o_ref[...] = jnp.maximum(h3, 0.0).astype(o_ref.dtype)


def _round_up(x, m):
    return ((x + m - 1) // m) * m


def net_hid2_1_forward(a, params, *, tile_m=512):
    """Forward pass of Net_hid2_1.

    a: (M, n_input) float32
    params: PyTorch-convention weights:
        w1 (n_hidden1, n_input),  b1 (n_hidden1,)
        w2 (n_hidden2, n_hidden1), b2 (n_hidden2,)
        w3 (n_output, n_hidden2),  b3 (n_output,)
    """
    M, n_in = a.shape
    w1 = params["w1"]            # (h1, n_in)
    w2 = params["w2"]            # (h2, h1)
    w3 = params["w3"]            # (n_out, h2)
    b1 = params["b1"].reshape(-1, 1)   # (h1, 1)
    b2 = params["b2"].reshape(-1, 1)   # (h2, 1)
    b3 = params["b3"].reshape(-1, 1)   # (n_out, 1)

    h1 = w1.shape[0]
    h2 = w2.shape[0]
    n_out = w3.shape[0]

    # Batch tile: lane-dense (multiple of 128). Cap so that large batches
    # still produce >=2 parallel grid steps (keeps both v7x TensorCores busy);
    # tiny batches just use a single 128-wide tile.
    tile_m = max(128, _round_up(tile_m, 128))
    half_m = max(128, _round_up(pl.cdiv(M, 2), 128))
    tile_m = min(tile_m, half_m)

    # Pad batch up to a tile multiple; padded columns are sliced off after.
    M_pad = _round_up(M, tile_m)
    x_t = a.T                                        # (n_in, M)
    if M_pad != M:
        x_t = jnp.pad(x_t, ((0, 0), (0, M_pad - M)))

    grid = (pl.cdiv(M_pad, tile_m),)

    resident = lambda shape: pl.BlockSpec(shape, lambda i: (0, 0))

    flops = 2 * M_pad * (n_in * h1 + h1 * h2 + h2 * n_out)
    bytes_accessed = 4 * (
        n_in * M_pad + n_out * M_pad               # activations in / out
        + h1 * n_in + h2 * h1 + n_out * h2         # weights
        + h1 + h2 + n_out                          # biases
    )

    out_t = pl.pallas_call(
        _mlp_kernel,
        out_shape=jax.ShapeDtypeStruct((n_out, M_pad), a.dtype),
        grid_spec=pl.GridSpec(
            grid=grid,
            in_specs=[
                pl.BlockSpec((n_in, tile_m), lambda i: (0, i)),  # X^T batch tile
                resident((h1, n_in)),    # W1
                resident((h1, 1)),       # b1
                resident((h2, h1)),      # W2
                resident((h2, 1)),       # b2
                resident((n_out, h2)),   # W3
                resident((n_out, 1)),    # b3
            ],
            out_specs=pl.BlockSpec((n_out, tile_m), lambda i: (0, i)),
        ),
        compiler_params=pltpu.CompilerParams(
            dimension_semantics=("parallel",),
        ),
        cost_estimate=pl.CostEstimate(
            flops=flops, transcendentals=0, bytes_accessed=bytes_accessed
        ),
    )(x_t, w1, b1, w2, b2, w3, b3)

    # Back to (M, n_out), dropping batch padding.
    return out_t[:, :M].T


def _reference(a, params):
    def leaky(x):
        return jnp.where(x > 0, x, 0.01 * x)
    h1 = leaky(a @ params["w1"].T + params["b1"])
    h2 = leaky(h1 @ params["w2"].T + params["b2"])
    return jnp.maximum(h2 @ params["w3"].T + params["b3"], 0.0)


if __name__ == "__main__":
    # Small, deterministic shapes consistent with the module's forward:
    # batch=16, n_input=16, n_hidden1=32, n_hidden2=32, n_output=8
    key = jax.random.PRNGKey(0)
    k_a, k1, k2, k3, kb1, kb2, kb3 = jax.random.split(key, 7)

    M, n_input, n_hidden1, n_hidden2, n_output = 16, 16, 32, 32, 8

    a = jax.random.normal(k_a, (M, n_input), dtype=jnp.float32)
    params = {
        "w1": jax.random.normal(k1, (n_hidden1, n_input), dtype=jnp.float32) * 0.1,
        "b1": jax.random.normal(kb1, (n_hidden1,), dtype=jnp.float32) * 0.1,
        "w2": jax.random.normal(k2, (n_hidden2, n_hidden1), dtype=jnp.float32) * 0.1,
        "b2": jax.random.normal(kb2, (n_hidden2,), dtype=jnp.float32) * 0.1,
        "w3": jax.random.normal(k3, (n_output, n_hidden2), dtype=jnp.float32) * 0.1,
        "b3": jax.random.normal(kb3, (n_output,), dtype=jnp.float32) * 0.1,
    }

    out = net_hid2_1_forward(a, params)
    out = jax.block_until_ready(out)

    ref = _reference(a, params)
    assert out.shape == (M, n_output)
    assert jnp.allclose(out, ref, atol=1e-5, rtol=1e-5), "mismatch vs reference"

    # A larger, non-tile-multiple batch to exercise padding + multi-step grid.
    M_big = 1300
    a_big = jax.random.normal(k_a, (M_big, n_input), dtype=jnp.float32)
    out_big = jax.block_until_ready(net_hid2_1_forward(a_big, params))
    ref_big = _reference(a_big, params)
    assert out_big.shape == (M_big, n_output)
    assert jnp.allclose(out_big, ref_big, atol=1e-5, rtol=1e-5), "mismatch (big batch)"

    print("KERNEL_OK")
</pallas_src>

<mosaic_0001>
module attributes {stable_mosaic.version = 11 : i64} {
  func.func @_mlp_kernel(%arg0: i32, %arg1: memref<16x128xf32, #tpu.memory_space<vmem>>, %arg2: memref<32x16xf32, #tpu.memory_space<vmem>>, %arg3: memref<32x1xf32, #tpu.memory_space<vmem>>, %arg4: memref<32x32xf32, #tpu.memory_space<vmem>>, %arg5: memref<32x1xf32, #tpu.memory_space<vmem>>, %arg6: memref<8x32xf32, #tpu.memory_space<vmem>>, %arg7: memref<8x1xf32, #tpu.memory_space<vmem>>, %arg8: memref<8x128xf32, #tpu.memory_space<vmem>>) attributes {dimension_semantics = [#tpu.dimension_semantics<parallel>], iteration_bounds = array<i64: 1>, scalar_prefetch = 0 : i64, scratch_operands = 0 : i64, tpu.core_type = #tpu.core_type<tc>, window_params = [{transform_indices = @transform_0, window_bounds = array<i64: 16, 128>}, {pipeline_mode = #tpu.pipeline_mode<synchronous>, transform_indices = @transform_1, window_bounds = array<i64: 32, 16>}, {pipeline_mode = #tpu.pipeline_mode<synchronous>, transform_indices = @transform_2, window_bounds = array<i64: 32, 1>}, {pipeline_mode = #tpu.pipeline_mode<synchronous>, transform_indices = @transform_3, window_bounds = array<i64: 32, 32>}, {pipeline_mode = #tpu.pipeline_mode<synchronous>, transform_indices = @transform_4, window_bounds = array<i64: 32, 1>}, {pipeline_mode = #tpu.pipeline_mode<synchronous>, transform_indices = @transform_5, window_bounds = array<i64: 8, 32>}, {pipeline_mode = #tpu.pipeline_mode<synchronous>, transform_indices = @transform_6, window_bounds = array<i64: 8, 1>}, {transform_indices = @transform_7, window_bounds = array<i64: 8, 128>}]} {
    %c0 = arith.constant 0 : index
    %c0_0 = arith.constant 0 : index
    %0 = vector.load %arg1[%c0, %c0_0] : memref<16x128xf32, #tpu.memory_space<vmem>>, vector<16x128xf32>
    %c0_1 = arith.constant 0 : index
    %c0_2 = arith.constant 0 : index
    %1 = vector.load %arg2[%c0_1, %c0_2] : memref<32x16xf32, #tpu.memory_space<vmem>>, vector<32x16xf32>
    %cst = arith.constant dense<0.000000e+00> : vector<32x128xf32>
    %2 = tpu.matmul %1, %0, %cst {dimension_numbers = #tpu.dot_dimension_numbers<[1], [0], [0], [1], [0, 0, 1, 1], [], []>} : vector<32x16xf32>, vector<16x128xf32>, vector<32x128xf32> -> vector<32x128xf32>
    %c0_3 = arith.constant 0 : index
    %c0_4 = arith.constant 0 : index
    %3 = vector.load %arg3[%c0_3, %c0_4] : memref<32x1xf32, #tpu.memory_space<vmem>>, vector<32x1xf32>
    %4 = vector.broadcast %3 : vector<32x1xf32> to vector<32x128xf32>
    %5 = arith.addf %2, %4 : vector<32x128xf32>
    %cst_5 = arith.constant 0.000000e+00 : f32
    %6 = vector.broadcast %cst_5 : f32 to vector<32x128xf32>
    %7 = arith.cmpf ogt, %5, %6 : vector<32x128xf32>
    %cst_6 = arith.constant 0.00999999977 : f32
    %8 = vector.broadcast %cst_6 : f32 to vector<32x128xf32>
    %9 = arith.mulf %8, %5 : vector<32x128xf32>
    %10 = arith.select %7, %5, %9 : vector<32x128xi1>, vector<32x128xf32>
    %c0_7 = arith.constant 0 : index
    %c0_8 = arith.constant 0 : index
    %11 = vector.load %arg4[%c0_7, %c0_8] : memref<32x32xf32, #tpu.memory_space<vmem>>, vector<32x32xf32>
    %cst_9 = arith.constant dense<0.000000e+00> : vector<32x128xf32>
    %12 = tpu.matmul %11, %10, %cst_9 {dimension_numbers = #tpu.dot_dimension_numbers<[1], [0], [0], [1], [0, 0, 1, 1], [], []>} : vector<32x32xf32>, vector<32x128xf32>, vector<32x128xf32> -> vector<32x128xf32>
    %c0_10 = arith.constant 0 : index
    %c0_11 = arith.constant 0 : index
    %13 = vector.load %arg5[%c0_10, %c0_11] : memref<32x1xf32, #tpu.memory_space<vmem>>, vector<32x1xf32>
    %14 = vector.broadcast %13 : vector<32x1xf32> to vector<32x128xf32>
    %15 = arith.addf %12, %14 : vector<32x128xf32>
    %cst_12 = arith.constant 0.000000e+00 : f32
    %16 = vector.broadcast %cst_12 : f32 to vector<32x128xf32>
    %17 = arith.cmpf ogt, %15, %16 : vector<32x128xf32>
    %cst_13 = arith.constant 0.00999999977 : f32
    %18 = vector.broadcast %cst_13 : f32 to vector<32x128xf32>
    %19 = arith.mulf %18, %15 : vector<32x128xf32>
    %20 = arith.select %17, %15, %19 : vector<32x128xi1>, vector<32x128xf32>
    %c0_14 = arith.constant 0 : index
    %c0_15 = arith.constant 0 : index
    %21 = vector.load %arg6[%c0_14, %c0_15] : memref<8x32xf32, #tpu.memory_space<vmem>>, vector<8x32xf32>
    %cst_16 = arith.constant dense<0.000000e+00> : vector<8x128xf32>
    %22 = tpu.matmul %21, %20, %cst_16 {dimension_numbers = #tpu.dot_dimension_numbers<[1], [0], [0], [1], [0, 0, 1, 1], [], []>} : vector<8x32xf32>, vector<32x128xf32>, vector<8x128xf32> -> vector<8x128xf32>
    %c0_17 = arith.constant 0 : index
    %c0_18 = arith.constant 0 : index
    %23 = vector.load %arg7[%c0_17, %c0_18] : memref<8x1xf32, #tpu.memory_space<vmem>>, vector<8x1xf32>
    %24 = vector.broadcast %23 : vector<8x1xf32> to vector<8x128xf32>
    %25 = arith.addf %22, %24 : vector<8x128xf32>
    %cst_19 = arith.constant 0.000000e+00 : f32
    %26 = vector.broadcast %cst_19 : f32 to vector<8x128xf32>
    %27 = arith.maximumf %25, %26 : vector<8x128xf32>
    %c0_20 = arith.constant 0 : index
    %c0_21 = arith.constant 0 : index
    %28 = vector.load %arg8[%c0_20, %c0_21] : memref<8x128xf32, #tpu.memory_space<vmem>>, vector<8x128xf32>
    tpu.vector_store %arg8[%c0_20, %c0_21], %27 {strides = array<i32>} : memref<8x128xf32, #tpu.memory_space<vmem>>, vector<8x128xf32>,
    return
  }
  func.func @transform_0(%arg0: i32) -> (i32, i32) {
    %c0_i32 = arith.constant 0 : i32
    %c0_i32_0 = arith.constant 0 : i32
    return %c0_i32, %arg0 : i32, i32
  }
  func.func @transform_1(%arg0: i32) -> (i32, i32) {
    %c0_i32 = arith.constant 0 : i32
    %c0_i32_0 = arith.constant 0 : i32
    %c0_i32_1 = arith.constant 0 : i32
    return %c0_i32, %c0_i32_0 : i32, i32
  }
  func.func @transform_2(%arg0: i32) -> (i32, i32) {
    %c0_i32 = arith.constant 0 : i32
    %c0_i32_0 = arith.constant 0 : i32
    %c0_i32_1 = arith.constant 0 : i32
    return %c0_i32, %c0_i32_0 : i32, i32
  }
  func.func @transform_3(%arg0: i32) -> (i32, i32) {
    %c0_i32 = arith.constant 0 : i32
    %c0_i32_0 = arith.constant 0 : i32
    %c0_i32_1 = arith.constant 0 : i32
    return %c0_i32, %c0_i32_0 : i32, i32
  }
  func.func @transform_4(%arg0: i32) -> (i32, i32) {
    %c0_i32 = arith.constant 0 : i32
    %c0_i32_0 = arith.constant 0 : i32
    %c0_i32_1 = arith.constant 0 : i32
    return %c0_i32, %c0_i32_0 : i32, i32
  }
  func.func @transform_5(%arg0: i32) -> (i32, i32) {
    %c0_i32 = arith.constant 0 : i32
    %c0_i32_0 = arith.constant 0 : i32
    %c0_i32_1 = arith.constant 0 : i32
    return %c0_i32, %c0_i32_0 : i32, i32
  }
  func.func @transform_6(%arg0: i32) -> (i32, i32) {
    %c0_i32 = arith.constant 0 : i32
    %c0_i32_0 = arith.constant 0 : i32
    %c0_i32_1 = arith.constant 0 : i32
    return %c0_i32, %c0_i32_0 : i32, i32
  }
  func.func @transform_7(%arg0: i32) -> (i32, i32) {
    %c0_i32 = arith.constant 0 : i32
    %c0_i32_0 = arith.constant 0 : i32
    return %c0_i32, %arg0 : i32, i32
  }
}

</mosaic_0001>

<bundles_post_ra>
// kernel: tpu_custom_call.1
= control target key start
LH: loop header
LB: loop body
LE: loop exit
PB: predicated region body
PF: predicated region fallthrough
CT: control target
= control target key end

     0   :  { %vm57_vm0 = vcmask 130048   ;;  %v513_v4 = vmov 0   ;;  %s639_s0 = inlined_call_operand.vmem [shape: f32[16,128], index: 0, kind: input, shape index: {}]   ;;  %s640_s1 = inlined_call_operand.vmem [shape: f32[32,16], index: 1, kind: input, shape index: {}]   ;;  %s641_s2 = inlined_call_operand.vmem [shape: f32[32,1], index: 2, kind: input, shape index: {}]   ;;  %s642_s3 = inlined_call_operand.vmem [shape: f32[32,32], index: 3, kind: input, shape index: {}]   ;;  %s643_s4 = inlined_call_operand.vmem [shape: f32[32,1], index: 4, kind: input, shape index: {}]   ;;  %s644_s5 = inlined_call_operand.vmem [shape: f32[8,32], index: 5, kind: input, shape index: {}]   ;;  %s645_s6 = inlined_call_operand.vmem [shape: f32[8,1], index: 6, kind: input, shape index: {}]   ;;  %s646_s7 = inlined_call_operand.hbm [shape: f32[8,128], index: 7, kind: output, shape index: {}]  }
   0x1   :  { %v27_v0 = vld [vmem:[%s639_s0] sm:$0xff]  ;;  %v28_v1 = vld [vmem:[%s639_s0 + $0x8] sm:$0xff]  ;;  %487 = vset.pattern.permute.xlu0 %v513_v4  ;;  %488 = vset.pattern.permute.xlu1 %v513_v4  ;;  %v35_v6 = vld [vmem:[%s641_s2 + $0x10] sm:$0xff] }
   0x2   :  { %v29_v2 = vld [vmem:[%s640_s1] sm:$0xff]  ;;  %v464_v3 = vpack.c.bf16 %v28_v1, %v27_v0  ;;  %v30_v7 = vld [vmem:[%s640_s1 + $0x8] sm:$0xff]  ;;  %49 = vperm.xlu1 %488, %v35_v6   ;;  %v31_v9 = vld [vmem:[%s640_s1 + $0x10] sm:$0xff] }
   0x3   :  { %433 = vmatprep.mubr.msk.f32.mxu0 %vm57_vm0, %v29_v2  ;;  %v33_v5 = vld [vmem:[%s641_s2] sm:$0xff]  ;;  %v34_v8 = vld [vmem:[%s641_s2 + $0x8] sm:$0xff]  ;;  %v36_v10 = vld [vmem:[%s641_s2 + $0x18] sm:$0xff] }
   0x4   :  { %465 = vmatprep.subr.bf16.mxu0 %v464_v3  ;;  %39 = vperm.xlu0 %487, %v33_v5  }
   0x5   :  { %467 = vmatpush3.bf16.msra.mxu0 %v464_v3 }
   0x6   :  { %12 = vsyncpa [#allocation3], 0  ;;  %v32_v11 = vld [vmem:[%s640_s1 + $0x18] sm:$0xff]  ;;  %v171_v12 = vld [vmem:[%s643_s4] sm:$0xff]  ;;  %54 = vperm.xlu1 %488, %v36_v10   ;;  %vm195_vm1 = vcmask 261120   ;;  %v514_v43 = vmov 0.0|0.0  }
   0x7   :  { %v172_v13 = vld [vmem:[%s643_s4 + $0x8] sm:$0xff]  ;;  %v173_v14 = vld [vmem:[%s643_s4 + $0x10] sm:$0xff]  ;;  %v174_v15 = vld [vmem:[%s643_s4 + $0x18] sm:$0xff]  ;;  %476 = vmatprep.subr.bf16.mxu0 %v514_v43  ;;  %vm515_vm6 = vmmov 0   ;;  %v516_v44 = vmov 0.0   ;;  %s517_s11 = smov [#allocation2]  }
   0x8   :  { %434 = vmatmul.mubr.msk.f32.vlgmr.msra.gmra.mrb[0].mxu0 %vm57_vm0, %v30_v7  ;;  %44 = vperm.xlu0 %487, %v34_v8   ;;  %v306_v16 = vld [vmem:[%s645_s6] sm:$0xff]  ;;  %v168_v40 = vld [vmem:[%s642_s3 + $0x8] sm:$0xff]  ;;  %v169_v41 = vld [vmem:[%s642_s3 + $0x10] sm:$0xff]  ;;  %s393_s12 = sshll.u32 %s517_s11, 4  ;;  %s394_s12 = int_to_ptr.vmem [resolvable:$true] %s393_s12 }
   0x9   :  { %436 = vmatprep.mubr.msk.f32.mxu0 %vm57_vm0, %v31_v9  ;;  %v167_v17 = vld [vmem:[%s642_s3] sm:$0xff]  ;;  %v170_v42 = vld [vmem:[%s642_s3 + $0x18] sm:$0xff]  ;;  %s489_s13 = scalar_lea.vmem %s394_s12, 128  ;;  %p494_p1 = scmp.lt.s32.totalorder %s394_s12, %s394_s12 }
   0xa   :  { %182 = vperm.xlu1 %488, %v172_v13   ;;  %447 = vmatprep.mubr.msk.f32.mxu1 %vm195_vm1, %v167_v17  ;;  %v305_v3 = vld [vmem:[%s644_s5] sm:$0xff]  ;;  %p490_p0 = scmp.ne.s32.totalorder %s394_s12, %s489_s13  ;;  %p495_p2 = scmp.lt.s32.totalorder %s489_s13, %s489_s13 }
   0xc   :  { %437 = vmatmul.mubr.msk.f32.gmra.mrb[2].mxu0 %vm57_vm0, %v32_v11  ;;  %177 = vperm.xlu0 %487, %v171_v12   ;;  %p496_p3 = por %p495_p2, %p494_p1 }
   0xd   :  { %461 = vmatprep.mubr.msk.f32.mxu0 %vm515_vm6, %v516_v44 }
   0xe   :  { %192 = vperm.xlu1 %488, %v174_v15   ;;  %p497_p4 = pnand %p496_p3, %p490_p0 }
  0x10   :  { %187 = vperm.xlu0 %487, %v173_v14  }
  0x14   :  { %309 = vperm.xlu0 %487, %v306_v16  }
  0x81   :  { %v50_v19 = vpop.permute.xlu1 %49 }
  0x83   :  { %v40_v18 = vpop.permute.xlu0 %39 }
  0x85   :  { %v55_v26 = vpop.permute.xlu1 %54 }
  0x87   :  { %v45_v20 = vpop.permute.xlu0 %44 }
  0x89   :  { %v183_v45 = vpop.permute.xlu1 %182 }
  0x8b   :  { %v178_v46 = vpop.permute.xlu0 %177 }
  0x8d   :  { %v193_v52 = vpop.permute.xlu1 %192 }
  0x8f   :  { %v188_v55 = vpop.permute.xlu0 %187 }
  0x93   :  { %v310_v4 = vpop.permute.xlu0 %309 }
  0xdb   :  { %v435_v21 = vpop.f32.mrb[0].mxu0 }
  0xdc   :  { %v142_v22 = vadd.f32 %v435_v21, %v45_v20  ;;  %v136_v23 = vpop.f32.mrb[1].mxu0 }
  0xdd   :  { %v137_v24 = vadd.f32 %v136_v23, %v40_v18 }
  0xde   :  { %v160_v25 = vmul.f32 0.01, %v142_v22  ;;  %vm156_vm2 = vcmp.gt.f32.partialorder %v142_v22, 0.0 }
  0xdf   :  { %v159_v27 = vmul.f32 0.01, %v137_v24  ;;  %v438_v28 = vpop.f32.mrb[2].mxu0  ;;  %vm155_vm3 = vcmp.gt.f32.partialorder %v137_v24, 0.0 }
  0xe0   :  { %v152_v29 = vadd.f32 %v438_v28, %v55_v26  ;;  %v146_v30 = vpop.f32.mrb[3].mxu0  ;;  %v164_v31 = vsel %vm156_vm2, %v142_v22, %v160_v25 }
  0xe1   :  { %v147_v32 = vadd.f32 %v146_v30, %v50_v19  ;;  %v163_v33 = vsel %vm155_vm3, %v137_v24, %v159_v27 }
  0xe2   :  { %vm158_vm4 = vcmp.gt.f32.partialorder %v152_v29, 0.0  ;;  %v162_v34 = vmul.f32 0.01, %v152_v29  ;;  %v468_v35 = vpack.c.bf16 %v164_v31, %v163_v33 }
  0xe3   :  { %vm157_vm5 = vcmp.gt.f32.partialorder %v147_v32, 0.0  ;;  %v161_v36 = vmul.f32 0.01, %v147_v32 }
  0xe4   :  { %469 = vmatprep.subr.bf16.mxu1 %v468_v35  ;;  %v166_v37 = vsel %vm158_vm4, %v152_v29, %v162_v34 }
  0xe5   :  { %471 = vmatpush3.bf16.msra.mxu1 %v468_v35  ;;  %v165_v38 = vsel %vm157_vm5, %v147_v32, %v161_v36 }
  0xe6   :  { %v472_v39 = vpack.c.bf16 %v166_v37, %v165_v38 }
  0xe8   :  { %473 = vmatprep.subr.bf16.mxu1 %v472_v39 }
  0xe9   :  { %475 = vmatpush3.bf16.msra.mxu1 %v472_v39 }
  0xec   :  { %448 = vmatmul.mubr.msk.f32.vlgmr.msra.gmra.mrb[0].mxu1 %vm195_vm1, %v168_v40 }
  0xed   :  { %450 = vmatprep.mubr.msk.f32.mxu1 %vm195_vm1, %v169_v41 }
  0xf0   :  { %451 = vmatmul.mubr.msk.f32.gmra.mrb[2].mxu1 %vm195_vm1, %v170_v42 }
 0x1bf   :  { %v449_v47 = vpop.f32.mrb[0].mxu1 }
 0x1c0   :  { %v280_v48 = vadd.f32 %v449_v47, %v183_v45  ;;  %v274_v49 = vpop.f32.mrb[1].mxu1 }
 0x1c1   :  { %v275_v50 = vadd.f32 %v274_v49, %v178_v46 }
 0x1c2   :  { %vm294_vm7 = vcmp.gt.f32.partialorder %v280_v48, 0.0  ;;  %v298_v51 = vmul.f32 0.01, %v280_v48 }
 0x1c3   :  { %vm293_vm8 = vcmp.gt.f32.partialorder %v275_v50, 0.0  ;;  %v297_v53 = vmul.f32 0.01, %v275_v50  ;;  %v452_v54 = vpop.f32.mrb[2].mxu1 }
 0x1c4   :  { %v302_v56 = vsel %vm294_vm7, %v280_v48, %v298_v51  ;;  %v290_v57 = vadd.f32 %v452_v54, %v193_v52  ;;  %v284_v58 = vpop.f32.mrb[3].mxu1 }
 0x1c5   :  { %v301_v59 = vsel %vm293_vm8, %v275_v50, %v297_v53  ;;  %v285_v60 = vadd.f32 %v284_v58, %v188_v55 }
 0x1c6   :  { %v477_v61 = vpack.c.bf16 %v302_v56, %v301_v59  ;;  %vm296_vm9 = vcmp.gt.f32.partialorder %v290_v57, 0.0  ;;  %v300_v62 = vmul.f32 0.01, %v290_v57 }
 0x1c7   :  { %vm295_vm10 = vcmp.gt.f32.partialorder %v285_v60, 0.0  ;;  %v299_v63 = vmul.f32 0.01, %v285_v60 }
 0x1c8   :  { %v304_v0 = vsel %vm296_vm9, %v290_v57, %v300_v62  ;;  %478 = vmatpush3.bf16.msra.mxu0 %v477_v61 }
 0x1c9   :  { %v303_v1 = vsel %vm295_vm10, %v285_v60, %v299_v63  ;;  %479 = vmatprep.subr.bf16.mxu0 %v514_v43 }
 0x1ca   :  { %v480_v2 = vpack.c.bf16 %v304_v0, %v303_v1 }
 0x1cc   :  { %481 = vmatpush3.bf16.msra.mxu0 %v480_v2 }
 0x1cf   :  { %462 = vmatmul.mubr.msk.f32.vlgmr.msra.gmra.mrb[4].mxu0 %vm195_vm1, %v305_v3 }
 0x2a2   :  { %v381_v5 = vpop.f32.mrb[4].mxu0 }
 0x2a3   :  { %v382_v6 = vadd.f32 %v381_v5, %v310_v4  ;;  %v463_v7 = vpop.f32.mrb[5].mxu0 }
 0x2a5   :  { %v385_v8 = vmax.f32 %v382_v6, 0.0 }
 0x2a7   :  { %386 = vst [vmem:[#allocation2] sm:$0xff] %v385_v8 }
 0x2a8   :  { %500 = shalt.err (!%p497_p4)
}
 0x2a9   :  { %s501_s15 = scalar_lea.hbm %s646_s7, 128 }
 0x2aa   :  { %p502_p5 = scmp.ne.s32.totalorder %s646_s7, %s501_s15  ;;  %p505_p6 = scmp.lt.u32.totalorder %s501_s15, %s646_s7 }
 0x2ac   :  { %p507_p7 = pnand %p505_p6, %p502_p5 }
 0x2ae   :  { %510 = shalt.err (!%p507_p7)
}
 0x2af   :  { %396 = dma.vmem_to_hbm [thread:$0]  %s394_s12, 128, %s646_s7, [#allocation3]  }
 0x2b0   :  { %511 = dma.done.wait [#allocation3], 128  }
 0x2b1   :  { %512 = vsyncadd [#allocation3], 4294967168 }
 0x2b2   :  { %400 = vsyncpa [#allocation3], 1 }

</bundles_post_ra>
